<compile_context>
chip_gen: v6e
topology: v6e:2x2x1
jax: 0.10.0
libtpu: 0.0.40
codegen_flags: <defaults>
</compile_context>

<pallas_src>
import functools

import jax
import jax.numpy as jnp
import numpy as np
from jax.experimental import pallas as pl
from jax.experimental.pallas import tpu as pltpu


# ------------------------------ Pallas kernel -------------------------------

def _bert_self_output_kernel(x_ref, res_ref, w_ref, b_ref, g_ref, beta_ref,
                             o_ref, *, eps):
    """Fused LayerNorm((x @ W + b) + residual) for one (bm, H) row tile."""
    # x / W arrive pre-cast to bf16 by the wrapper; MXU accumulates in f32.
    y = jnp.dot(x_ref[...], w_ref[...], preferred_element_type=jnp.float32)
    # dense bias + residual (dropout == identity in eval mode); all f32.
    y = y + b_ref[...] + res_ref[...].astype(jnp.float32)

    # LayerNorm over the hidden (lane) dim, biased variance (torch semantics),
    # one-pass statistics.  Tail tiles (M % bm != 0) compute stats on padded
    # rows too — harmless: LN is strictly per-row and Pallas masks the store
    # of the out-of-range rows.  Do NOT "fix" this into a cross-row reduction.
    mean = jnp.mean(y, axis=-1, keepdims=True)
    var = jnp.mean(y * y, axis=-1, keepdims=True) - mean * mean
    scale = g_ref[...] * jax.lax.rsqrt(var + eps)   # gamma folded into scale
    o_ref[...] = ((y - mean) * scale + beta_ref[...]).astype(o_ref.dtype)


def bert_self_output(hidden_states, input_tensor, w, b, gamma, beta, *,
                     eps=1e-12, block_m=512,
                     vmem_limit_bytes=48 * 1024 * 1024):
    """Fused dense + residual + LayerNorm.

    hidden_states / input_tensor : (M, H) row-major slabs, M = batch * seq.
    w                            : (H, H) == dense.weight.T, i.e. (in, out)
                                   layout.  Pass `torch_weight.T`, NOT the raw
                                   PyTorch (out, in) tensor — for a square
                                   weight a wrong layout is silently transposed.
    b, gamma, beta               : (H,) dense bias / LayerNorm weight / bias.
    """
    M, K = hidden_states.shape
    Kw, N = w.shape
    assert Kw == K, "w must be dense.weight.T, i.e. (in_features, out_features)"
    assert input_tensor.shape == (M, N)

    out_dtype = hidden_states.dtype

    # Cast ONCE here (not per grid step): activations & weight stream as bf16
    # (halves HBM traffic; every generation prefers bf16 MXU operands), while
    # bias / gamma / beta stay f32 for the f32 elementwise epilogue.
    x = hidden_states.astype(jnp.bfloat16)
    res = input_tensor.astype(jnp.bfloat16)
    wq = w.astype(jnp.bfloat16)
    b2 = b.reshape(1, N).astype(jnp.float32)
    g2 = gamma.reshape(1, N).astype(jnp.float32)
    beta2 = beta.reshape(1, N).astype(jnp.float32)

    # Row tile: whole M if it fits, else MXU-aligned (256 covers the 2x256^2
    # MXU of v6e/v7x and 2 passes of v5e's 4x128^2 MXU).
    mxu_align = 256
    bm = min(block_m, M)
    if bm < M:
        align = mxu_align if bm >= mxu_align else 8
        bm = max(align, (bm // align) * align)
    # Keep >= 2 grid steps for large M so the "parallel" axis can shard across
    # both TensorCores on v7x.
    if M >= 2 * mxu_align and pl.cdiv(M, bm) < 2:
        bm = max(mxu_align, (M // 2 // mxu_align) * mxu_align)
    grid = (pl.cdiv(M, bm),)

    cost = pl.CostEstimate(
        flops=2 * M * K * N,
        transcendentals=M,                              # one rsqrt per row
        bytes_accessed=(x.size * x.dtype.itemsize
                        + res.size * res.dtype.itemsize
                        + wq.size * wq.dtype.itemsize
                        + M * N * jnp.dtype(out_dtype).itemsize
                        + 3 * N * 4))

    resident = dict(pipeline_mode=pl.Buffered(1))       # grid-invariant operands
    kernel = functools.partial(_bert_self_output_kernel, eps=eps)
    return pl.pallas_call(
        kernel,
        out_shape=jax.ShapeDtypeStruct((M, N), out_dtype),
        grid=grid,
        in_specs=[
            pl.BlockSpec((bm, K), lambda i: (i, 0)),              # x row tile
            pl.BlockSpec((bm, N), lambda i: (i, 0)),              # residual tile
            pl.BlockSpec((K, N), lambda i: (0, 0), **resident),   # dense weight
            pl.BlockSpec((1, N), lambda i: (0, 0), **resident),   # dense bias
            pl.BlockSpec((1, N), lambda i: (0, 0), **resident),   # LN gamma
            pl.BlockSpec((1, N), lambda i: (0, 0), **resident),   # LN beta
        ],
        out_specs=pl.BlockSpec((bm, N), lambda i: (i, 0)),
        cost_estimate=cost,
        compiler_params=pltpu.CompilerParams(
            dimension_semantics=("parallel",),
            vmem_limit_bytes=vmem_limit_bytes),
    )(x, res, wq, b2, g2, beta2)


# ------------------------------ plain-JAX ref --------------------------------

def _ref_self_output(x, res, w, b, gamma, beta, eps):
    """f32 reference with PyTorch LayerNorm semantics (biased variance)."""
    y = (jnp.dot(x.astype(jnp.float32), w.astype(jnp.float32))
         + b + res.astype(jnp.float32))
    mean = jnp.mean(y, axis=-1, keepdims=True)
    var = jnp.mean((y - mean) ** 2, axis=-1, keepdims=True)
    return (y - mean) * jax.lax.rsqrt(var + eps) * gamma + beta


# ---------------------------------- main -------------------------------------

if __name__ == "__main__":
    key = jax.random.PRNGKey(0)
    k_x, k_res, k_w = jax.random.split(key, 3)

    B, S, H = 2, 8, 32
    eps = 1e-12
    std = 0.02  # init_bert_weights initializer_range

    # bf16 activations in / bf16 out (the streamed dtype the kernel is built for).
    hidden_states = jax.random.normal(k_x, (B, S, H), jnp.float32).astype(jnp.bfloat16)
    input_tensor = jax.random.normal(k_res, (B, S, H), jnp.float32).astype(jnp.bfloat16)

    w = std * jax.random.normal(k_w, (H, H), jnp.float32)   # dense.weight.T layout
    b = jnp.zeros((H,), jnp.float32)                        # dense.bias
    gamma = jnp.ones((H,), jnp.float32)                     # LayerNorm.weight
    beta = jnp.zeros((H,), jnp.float32)                     # LayerNorm.bias

    x2d = hidden_states.reshape(B * S, H)
    r2d = input_tensor.reshape(B * S, H)

    # block_m=8 -> grid=(2,) at these toy shapes so the tiled / pipelined path
    # (the one that matters at real B*S) is actually exercised.
    out = bert_self_output(x2d, r2d, w, b, gamma, beta, eps=eps, block_m=8)
    jax.block_until_ready(out)
    out = out.reshape(B, S, H)

    ref = _ref_self_output(x2d, r2d, w, b, gamma, beta, eps).reshape(B, S, H)
    np.testing.assert_allclose(np.asarray(out.astype(jnp.float32)),
                               np.asarray(ref), atol=2e-2, rtol=2e-2)

    print("KERNEL_OK")
</pallas_src>

<mosaic_0001>
module attributes {stable_mosaic.version = 11 : i64} {
  func.func @_bert_self_output_kernel(%arg0: i32, %arg1: memref<8x32xbf16, #tpu.memory_space<vmem>>, %arg2: memref<8x32xbf16, #tpu.memory_space<vmem>>, %arg3: memref<32x32xbf16, #tpu.memory_space<vmem>>, %arg4: memref<1x32xf32, #tpu.memory_space<vmem>>, %arg5: memref<1x32xf32, #tpu.memory_space<vmem>>, %arg6: memref<1x32xf32, #tpu.memory_space<vmem>>, %arg7: memref<8x32xbf16, #tpu.memory_space<vmem>>) attributes {dimension_semantics = [#tpu.dimension_semantics<parallel>], iteration_bounds = array<i64: 2>, scalar_prefetch = 0 : i64, scratch_operands = 0 : i64, tpu.core_type = #tpu.core_type<tc>, window_params = [{transform_indices = @transform_0, window_bounds = array<i64: 8, 32>}, {transform_indices = @transform_1, window_bounds = array<i64: 8, 32>}, {pipeline_mode = #tpu.pipeline_mode<synchronous>, transform_indices = @transform_2, window_bounds = array<i64: 32, 32>}, {pipeline_mode = #tpu.pipeline_mode<synchronous>, transform_indices = @transform_3, window_bounds = array<i64: 1, 32>}, {pipeline_mode = #tpu.pipeline_mode<synchronous>, transform_indices = @transform_4, window_bounds = array<i64: 1, 32>}, {pipeline_mode = #tpu.pipeline_mode<synchronous>, transform_indices = @transform_5, window_bounds = array<i64: 1, 32>}, {transform_indices = @transform_6, window_bounds = array<i64: 8, 32>}]} {
    %c0 = arith.constant 0 : index
    %c0_0 = arith.constant 0 : index
    %0 = vector.load %arg1[%c0, %c0_0] : memref<8x32xbf16, #tpu.memory_space<vmem>>, vector<8x32xbf16>
    %c0_1 = arith.constant 0 : index
    %c0_2 = arith.constant 0 : index
    %1 = vector.load %arg3[%c0_1, %c0_2] : memref<32x32xbf16, #tpu.memory_space<vmem>>, vector<32x32xbf16>
    %cst = arith.constant dense<0.000000e+00> : vector<8x32xf32>
    %2 = tpu.matmul %0, %1, %cst {dimension_numbers = #tpu.dot_dimension_numbers<[1], [0], [0], [1], [0, 0, 1, 1], [], []>} : vector<8x32xbf16>, vector<32x32xbf16>, vector<8x32xf32> -> vector<8x32xf32>
    %c0_3 = arith.constant 0 : index
    %c0_4 = arith.constant 0 : index
    %3 = vector.load %arg4[%c0_3, %c0_4] : memref<1x32xf32, #tpu.memory_space<vmem>>, vector<1x32xf32>
    %4 = vector.broadcast %3 : vector<1x32xf32> to vector<8x32xf32>
    %5 = arith.addf %2, %4 : vector<8x32xf32>
    %c0_5 = arith.constant 0 : index
    %c0_6 = arith.constant 0 : index
    %6 = vector.load %arg2[%c0_5, %c0_6] : memref<8x32xbf16, #tpu.memory_space<vmem>>, vector<8x32xbf16>
    %7 = arith.extf %6 : vector<8x32xbf16> to vector<8x32xf32>
    %8 = arith.addf %5, %7 : vector<8x32xf32>
    %cst_7 = arith.constant dense<0.000000e+00> : vector<8xf32>
    %9 = vector.multi_reduction <add>, %8, %cst_7 [1] : vector<8x32xf32> to vector<8xf32>
    %10 = vector.shape_cast %9 : vector<8xf32> to vector<8x1xf32>
    %cst_8 = arith.constant 3.200000e+01 : f32
    %11 = vector.broadcast %cst_8 : f32 to vector<8x1xf32>
    %12 = arith.divf %10, %11 : vector<8x1xf32>
    %13 = arith.mulf %8, %8 : vector<8x32xf32>
    %cst_9 = arith.constant dense<0.000000e+00> : vector<8xf32>
    %14 = vector.multi_reduction <add>, %13, %cst_9 [1] : vector<8x32xf32> to vector<8xf32>
    %15 = vector.shape_cast %14 : vector<8xf32> to vector<8x1xf32>
    %cst_10 = arith.constant 3.200000e+01 : f32
    %16 = vector.broadcast %cst_10 : f32 to vector<8x1xf32>
    %17 = arith.divf %15, %16 : vector<8x1xf32>
    %18 = arith.mulf %12, %12 : vector<8x1xf32>
    %19 = arith.subf %17, %18 : vector<8x1xf32>
    %c0_11 = arith.constant 0 : index
    %c0_12 = arith.constant 0 : index
    %20 = vector.load %arg5[%c0_11, %c0_12] : memref<1x32xf32, #tpu.memory_space<vmem>>, vector<1x32xf32>
    %cst_13 = arith.constant 9.99999996E-13 : f32
    %21 = vector.broadcast %cst_13 : f32 to vector<8x1xf32>
    %22 = arith.addf %19, %21 : vector<8x1xf32>
    %23 = math.rsqrt %22 : vector<8x1xf32>
    %24 = vector.broadcast %20 : vector<1x32xf32> to vector<8x32xf32>
    %25 = vector.broadcast %23 : vector<8x1xf32> to vector<8x32xf32>
    %26 = arith.mulf %24, %25 : vector<8x32xf32>
    %27 = vector.broadcast %12 : vector<8x1xf32> to vector<8x32xf32>
    %28 = arith.subf %8, %27 : vector<8x32xf32>
    %29 = arith.mulf %28, %26 : vector<8x32xf32>
    %c0_14 = arith.constant 0 : index
    %c0_15 = arith.constant 0 : index
    %30 = vector.load %arg6[%c0_14, %c0_15] : memref<1x32xf32, #tpu.memory_space<vmem>>, vector<1x32xf32>
    %31 = vector.broadcast %30 : vector<1x32xf32> to vector<8x32xf32>
    %32 = arith.addf %29, %31 : vector<8x32xf32>
    %33 = arith.truncf %32 : vector<8x32xf32> to vector<8x32xbf16>
    %c0_16 = arith.constant 0 : index
    %c0_17 = arith.constant 0 : index
    %34 = vector.load %arg7[%c0_16, %c0_17] : memref<8x32xbf16, #tpu.memory_space<vmem>>, vector<8x32xbf16>
    tpu.vector_store %arg7[%c0_16, %c0_17], %33 {strides = array<i32>} : memref<8x32xbf16, #tpu.memory_space<vmem>>, vector<8x32xbf16>,
    return
  }
  func.func @transform_0(%arg0: i32) -> (i32, i32) {
    %c0_i32 = arith.constant 0 : i32
    %c0_i32_0 = arith.constant 0 : i32
    return %arg0, %c0_i32 : i32, i32
  }
  func.func @transform_1(%arg0: i32) -> (i32, i32) {
    %c0_i32 = arith.constant 0 : i32
    %c0_i32_0 = arith.constant 0 : i32
    return %arg0, %c0_i32 : i32, i32
  }
  func.func @transform_2(%arg0: i32) -> (i32, i32) {
    %c0_i32 = arith.constant 0 : i32
    %c0_i32_0 = arith.constant 0 : i32
    %c0_i32_1 = arith.constant 0 : i32
    return %c0_i32, %c0_i32_0 : i32, i32
  }
  func.func @transform_3(%arg0: i32) -> (i32, i32) {
    %c0_i32 = arith.constant 0 : i32
    %c0_i32_0 = arith.constant 0 : i32
    %c0_i32_1 = arith.constant 0 : i32
    return %c0_i32, %c0_i32_0 : i32, i32
  }
  func.func @transform_4(%arg0: i32) -> (i32, i32) {
    %c0_i32 = arith.constant 0 : i32
    %c0_i32_0 = arith.constant 0 : i32
    %c0_i32_1 = arith.constant 0 : i32
    return %c0_i32, %c0_i32_0 : i32, i32
  }
  func.func @transform_5(%arg0: i32) -> (i32, i32) {
    %c0_i32 = arith.constant 0 : i32
    %c0_i32_0 = arith.constant 0 : i32
    %c0_i32_1 = arith.constant 0 : i32
    return %c0_i32, %c0_i32_0 : i32, i32
  }
  func.func @transform_6(%arg0: i32) -> (i32, i32) {
    %c0_i32 = arith.constant 0 : i32
    %c0_i32_0 = arith.constant 0 : i32
    return %arg0, %c0_i32 : i32, i32
  }
}

</mosaic_0001>

<bundles_post_ra>
// kernel: tpu_custom_call.1
= control target key start
LH: loop header
LB: loop body
LE: loop exit
PB: predicated region body
PF: predicated region fallthrough
CT: control target
= control target key end

     0   :  { %s1051_s0 = inlined_call_operand.hbm [shape: bf16[16,32], index: 0, kind: input, shape index: {}]   ;;  %s1052_s1 = inlined_call_operand.hbm [shape: bf16[16,32], index: 1, kind: input, shape index: {}]   ;;  %s1053_s2 = inlined_call_operand.hbm [shape: bf16[32,32], index: 2, kind: input, shape index: {}]   ;;  %s1054_s3 = inlined_call_operand.vmem [shape: f32[1,32], index: 3, kind: input, shape index: {}]   ;;  %s1055_s4 = inlined_call_operand.vmem [shape: f32[1,32], index: 4, kind: input, shape index: {}]   ;;  %s1056_s5 = inlined_call_operand.vmem [shape: f32[1,32], index: 5, kind: input, shape index: {}]   ;;  %s1057_s6 = inlined_call_operand.hbm [shape: bf16[16,32], index: 6, kind: output, shape index: {}]  }
   0x1   :  { %1063 = sst [smem:[#allocation15_spill]] %s1053_s2 }
   0x2   :  { %11 = vsyncpa [#allocation3], 0 }
   0x3   :  { %13 = vsyncpa [#allocation3 + $0x1], 0 }
   0x4   :  { %14 = vsyncpa [#allocation6], 0 }
   0x5   :  { %16 = vsyncpa [#allocation6 + $0x1], 0 }
   0x6   :  { %17 = vsyncpa [#allocation4], 0 }
   0x7   :  { %19 = vsyncpa [#allocation4 + $0x1], 0  ;;  %s844_s21 = smov 0   ;;  %s846_s22 = smov 0  }
   0x8   :  { %s848_s23 = smov 0   ;;  %s850_s24 = smov 0  }
   0x9 LB: > { %1064 = sst [smem:[#allocation13_spill]] %s795_s23  ;;  %s865_s25 = sadd.s32 4294967295, %s799_s24   ;;  %s799_s24 = sphi %s850_s24, %s1085_s24   ;;  %s795_s23 = sphi %s848_s23, %s1082_s23   ;;  %s791_s22 = sphi %s846_s22, %s1084_s22   ;;  %s787_s21 = sphi %s844_s21, %s1083_s21  }
   0xa   : > { %s541_s26 = sadd.s32 4294967294, %s799_s24   ;;  %p45_p0 = scmp.ne.s32.totalorder %s791_s22, %s787_s21 }
   0xb   : > { %p1059_p1 = scmp.eq.s32.totalorder %s865_s25, 0  ;;  %p185_p3 = scmp.eq.s32.totalorder %s541_s26, 1 }
   0xc   : > { %p542_p5 = scmp.ge.s32.totalorder %s799_s24, 1  ;;  %p192_p7 = scmp.lt.s32.totalorder %s799_s24, 3 }
   0xd   : > { %p874_p4 = por %p1059_p1, %p45_p0  ;;  %p879_p6 = por %p185_p3, %p45_p0 }
   0xe   : > { %p884_p8 = pnand %p542_p5, %p192_p7  ;;  %s801_s30 = smov [#allocation7]  }
   0xf   : > { %s1065_s27 = scalar_select %p874_p4, 1, 0 }
  0x10   : > { %s1066_s28 = scalar_select %p879_p6, 1, 0 }
  0x11   : > { %s1067_s29 = scalar_select %p884_p8, 1, 0 }
  0x12   : > { %s204_s7 = sshll.u32 %s801_s30, 4  ;;  %p585_p9 = pneg %p884_p8  ;;  %s205_s7 = int_to_ptr.vmem [resolvable:$true] %s204_s7 }
  0x13   : > { %s898_s9 = sadd.s32 1, %s799_s24   ;;  %s32_s10 = sadd.s32 1, %s795_s23 }
  0x14   : > { %p893_p11 = pnand %p585_p9, %p1059_p1  ;;  %s29_s11 = ssub.s32 %s799_s24, %s898_s9 }
  0x15   : > { %s656_s12 = scalar_lea.vmem %s205_s7, 256  ;;  %p664_p5 = scmp.lt.s32.totalorder %s205_s7, %s205_s7 }
  0x16   : > { %p647_p12 = pneg %p893_p11  ;;  %p657_p13 = scmp.ne.s32.totalorder %s205_s7, %s656_s12 }
  0x17   : > { %p665_p7 = scmp.lt.s32.totalorder %s656_s12, %s656_s12 }
  0x18   : > { %p659_p0 = pnand %p657_p13, %p647_p12 }
  0x19   : > { %p666_p10 = por %p665_p7, %p664_p5 }
  0x1a   : > { %p660_p3 = pneg %p659_p0 }
  0x1c   : > { %p667_p2 = pnand %p666_p10, %p660_p3 }
  0x1e   : > { %670 = shalt.err (!%p667_p2)
}
  0x1f   : > { %s802_s13 = smov 64   ;;  %s803_s14 = smov 4  }
  0x20   : > { %s1069_s2 = sld [smem:[#allocation15_spill]]  ;;  %p30_p9 = scmp.eq.s32.totalorder %s29_s11, 0 }
  0x21   : > { %p39_p12 = scmp.ne.s32.totalorder %s795_s23, %s791_s22  ;;  %p40_p10 = scmp.eq.s32.totalorder %s799_s24, 0 }
  0x22   : > { %p601_p2 = scmp.lt.s32.totalorder %s799_s24, 2  ;;  %p1071_p0 = scmp.eq.s32.totalorder %s865_s25, 1 }
  0x23   : > { %s915_s17 = scalar_select %p30_p9, %s795_s23, %s32_s10  }
  0x24   : > { %p41_p13 = por %p40_p10, %p39_p12  ;;  %p919_p3 = por %p1071_p0, %p39_p12 }
  0x25   : > { %1070 = sst [smem:[#allocation14_spill]] %s915_s17  ;;  %s227_s19 = sand.u32 1, %s795_s23  }
  0x26   : > { %588 = dma.hbm_to_vmem [thread:$0]  (!%p893_p11), %s1069_s2, 256, %s205_s7, [#allocation6], %s802_s13, %s802_s13, %s803_s14  }
  0x27   : > { %s1072_s18 = scalar_select %p919_p3, 1, 0 }
  0x28   : > { %s546_s20 = sshll.u32 %s799_s24, 6  ;;  %s925_s26 = sshll.u32 %s227_s19, 2 }
  0x29   : > { %s930_s7 = scalar_lea.hbm %s1051_s0, %s546_s20  ;;  %s231_s10 = scalar_lea.vmem [#allocation2], %s925_s26 }
  0x2a   : > { %s238_s11 = sshll.u32 %s231_s10, 4  ;;  %p933_p11 = pnand %p601_p2, %p41_p13  ;;  %s239_s11 = int_to_ptr.vmem [resolvable:$true] %s238_s11 }
  0x2b   : > { %s940_s15 = scalar_lea.hbm %s1052_s1, %s546_s20  ;;  %s228_s16 = scalar_lea.sflag [#allocation3], %s227_s19 }
  0x2c   : > { %s671_s30 = scalar_lea.hbm %s930_s7, 64  ;;  %p673_p7 = pneg %p933_p11 }
  0x2d   : > { %p672_p5 = scmp.ne.s32.totalorder %s930_s7, %s671_s30  ;;  %s676_s2 = scalar_lea.hbm %s1051_s0, 128 }
  0x2e   : > { %p677_p10 = scmp.lt.s32.totalorder %s930_s7, %s1051_s0  ;;  %p678_p2 = scmp.lt.s32.totalorder %s676_s2, %s671_s30 }
  0x2f   : > { %p674_p9 = pnand %p673_p7, %p672_p5 }
  0x30   : > { %p679_p13 = por %p678_p2, %p677_p10 }
  0x31   : > { %p675_p12 = pneg %p674_p9 }
  0x33   : > { %p680_p0 = pnand %p679_p13, %p675_p12 }
  0x35   : > { %683 = shalt.err (!%p680_p0)
}
  0x36   : > { %s684_s19 = scalar_lea.vmem %s239_s11, 64  ;;  %s804_s20 = smov [#allocation2]  }
  0x37   : > { %p685_p1 = scmp.ne.s32.totalorder %s239_s11, %s684_s19  ;;  %s689_s13 = sshll.u32 %s804_s20, 4  ;;  %s690_s13 = int_to_ptr.vmem [resolvable:$false] %s689_s13 }
  0x38   : > { %s691_s14 = scalar_lea.vmem %s690_s13, 128  ;;  %p692_p9 = scmp.lt.s32.totalorder %s239_s11, %s690_s13 }
  0x39   : > { %p687_p6 = pnand %p685_p1, %p673_p7  ;;  %p693_p3 = scmp.lt.s32.totalorder %s691_s14, %s684_s19 }
  0x3b   : > { %p688_p5 = pneg %p687_p6  ;;  %p694_p4 = por %p693_p3, %p692_p9 }
  0x3d   : > { %p695_p8 = pnand %p694_p4, %p688_p5 }
  0x3f   : > { %698 = shalt.err (!%p695_p8)
}
  0x40   : > { %592 = dma.hbm_to_vmem [thread:$0]  (!%p933_p11), %s930_s7, 64, %s239_s11, %s228_s16  }
  0x41   : > { %s245_s2 = sand.u32 1, %s799_s24   ;;  %s249_s23 = scalar_lea.vmem [#allocation5], %s925_s26 }
  0x42   : > { %s256_s17 = sshll.u32 %s249_s23, 4  ;;  %s246_s30 = scalar_lea.sflag [#allocation6], %s245_s2  ;;  %s257_s17 = int_to_ptr.vmem [resolvable:$true] %s256_s17 }
  0x43   : > { %s699_s8 = scalar_lea.hbm %s940_s15, 64  ;;  %s704_s20 = scalar_lea.hbm %s1052_s1, 128 }
  0x44   : > { %p700_p1 = scmp.ne.s32.totalorder %s940_s15, %s699_s8  ;;  %p705_p8 = scmp.lt.s32.totalorder %s940_s15, %s1052_s1 }
  0x45   : > { %p706_p3 = scmp.lt.s32.totalorder %s704_s20, %s699_s8 }
  0x46   : > { %p702_p4 = pnand %p700_p1, %p673_p7 }
  0x47   : > { %p707_p12 = por %p706_p3, %p705_p8 }
  0x48   : > { %p703_p6 = pneg %p702_p4 }
  0x4a   : > { %p708_p10 = pnand %p707_p12, %p703_p6 }
  0x4c   : > { %711 = shalt.err (!%p708_p10)
}
  0x4d   : > { %s712_s26 = scalar_lea.vmem %s257_s17, 64  ;;  %s805_s7 = smov [#allocation5]  }
  0x4e   : > { %p713_p2 = scmp.ne.s32.totalorder %s257_s17, %s712_s26  ;;  %s717_s11 = sshll.u32 %s805_s7, 4  ;;  %s718_s11 = int_to_ptr.vmem [resolvable:$false] %s717_s11 }
  0x4f   : > { %s719_s16 = scalar_lea.vmem %s718_s11, 128  ;;  %p720_p5 = scmp.lt.s32.totalorder %s257_s17, %s718_s11 }
  0x50   : > { %p715_p13 = pnand %p713_p2, %p673_p7  ;;  %p721_p9 = scmp.lt.s32.totalorder %s719_s16, %s712_s26 }
  0x52   : > { %p716_p0 = pneg %p715_p13  ;;  %p722_p1 = por %p721_p9, %p720_p5 }
  0x54   : > { %p723_p4 = pnand %p722_p1, %p716_p0 }
  0x56   : > { %726 = shalt.err (!%p723_p4)
}
  0x57   : > { %595 = dma.hbm_to_vmem [thread:$0]  (!%p933_p11), %s940_s15, 64, %s257_s17, %s246_s30  }
  0x58   : > { %p1074_p6 = scmp.ne.s32.totalorder %s1067_s29, 0 }
  0x59   : > { %s985_s2 = sand.u32 (!%p1074_p6), 1, %s791_s22   ;;  %p1075_p7 = scmp.ne.s32.totalorder (!%p1074_p6), %s1065_s27, 0 }
  0x5a   : > { %265 = sbr.rel (%p1074_p6) target bundleno = 492 (0x1ec), region = 44  ;;  %s988_s23 = sshll.u32 (!%p1074_p6), %s985_s2, 2 }
  0x5b   : > { %s268_s8 = scalar_lea.sflag (!%p1074_p6), [#allocation3], %s985_s2  ;;  %s271_s10 = scalar_lea.vmem (!%p1074_p6), [#allocation2], %s988_s23 }
  0x5f   : > { %770 = dma.done.wait (%p1075_p7), %s268_s8, 64  }
  0x60   : > { %772 = vsyncadd (%p1075_p7), %s268_s8, 4294967232  ;;  %s276_s29 = sand.u32 1, %s865_s25   ;;  %s280_s15 = scalar_lea.vmem [#allocation5], %s988_s23 }
  0x61   : > { %s277_s12 = scalar_lea.sflag [#allocation6], %s276_s29 }
  0x62   : > { %774 = dma.done.wait (%p1075_p7), %s277_s12, 64  }
  0x63   : > { %776 = vsyncadd (%p1075_p7), %s277_s12, 4294967232  ;;  %p1076_p11 = scmp.eq.s32.totalorder %s865_s25, 0 }
  0x65   : > { %778 = dma.done.wait (%p1076_p11), [#allocation6], 256   ;;  %p1077_p8 = pmov %p1076_p11 }
  0x66   : > { %v806_v0 = vmov 0.0   ;;  %vm807_vm0 = vmmov 0   ;;  %v641_v1 = vld [vmem:[#allocation7 + $0x8] sm:$0xff]   ;;  %v642_v2 = vld [vmem:[#allocation7] sm:$0xff]   ;;  %v319_v3 = vld [vmem:[%s271_s10] sm:$0xf] }
  0x67   : > { %780 = vsyncadd (%p1077_p8), [#allocation6], 4294967040  ;;  %567 = vmatprep.subr.bf16.mxu0 %v806_v0  ;;  %571 = vmatprep.mubr.msk.bf16.mxu0 %vm807_vm0, %v806_v0  ;;  %vm343_vm1 = vcmask 261120   ;;  %v387_v4 = vld [vmem:[%s280_s15] sm:$0xf]  ;;  %s561_s14 = sshll.u32 %s865_s25, 6 }
  0x68   : > { %568 = vmatpush3.bf16.msra.mxu0 %v641_v1  ;;  %v554_v5 = vld [vmem:[%s1054_s3] ss:$0 sm:$0xff]  ;;  %v388_v6 = vunpack.c.l.bf16 %v387_v4  ;;  %s317_s26 = scalar_lea.vmem [#allocation8], %s988_s23  ;;  %vm423_vm2 = vcmask 257024   ;;  %s437_s8 = scalar_lea.hbm %s1057_s6, %s561_s14 }
  0x69   : > { %569 = vmatprep.subr.bf16.mxu0 %v806_v0  ;;  %v558_v23 = vld [vmem:[%s1055_s4] ss:$0 sm:$0xff]  ;;  %s439_s7 = sshll.u32 %s317_s26, 4  ;;  %s426_s10 = scalar_lea.sflag [#allocation4], %s985_s2  ;;  %s440_s7 = int_to_ptr.vmem [resolvable:$true] %s439_s7 }
  0x6a   : > { %v559_v27 = vld [vmem:[%s1056_s5] ss:$0 sm:$0xff]  ;;  %s727_s29 = scalar_lea.vmem %s440_s7, 64  ;;  %p1078_p12 = scmp.ne.s32.totalorder %s1072_s18, 0 }
  0x6b   : > { %p728_p3 = scmp.ne.s32.totalorder %s440_s7, %s727_s29  ;;  %s808_s12 = smov [#allocation8]  }
  0x6c   : > { %570 = vmatpush3.bf16.msra.mxu0 %v642_v2  ;;  %s731_s15 = sshll.u32 %s808_s12, 4  ;;  %s732_s15 = int_to_ptr.vmem [resolvable:$false] %s731_s15 }
  0x6d   : > { %p729_p10 = pnand %p728_p3, %p1078_p12  ;;  %s733_s25 = scalar_lea.vmem %s732_s15, 128 }
  0x6e   : > { %p734_p13 = scmp.lt.s32.totalorder %s440_s7, %s732_s15  ;;  %p735_p0 = scmp.lt.s32.totalorder %s733_s25, %s727_s29 }
  0x6f   : > { %572 = vmatmul.mubr.msk.bf16.vlgmr.msra.gmra.mxu0 %vm343_vm1, %v319_v3  ;;  %p730_p2 = pneg %p729_p10 }
  0x70   : > { %p736_p5 = por %p735_p0, %p734_p13 }
  0x72   : > { %p737_p9 = pnand %p736_p5, %p730_p2 }
 0x12f   : > { %v381_v7 = vpop.f32.mrf.mxu0 }
 0x130   : > { %v382_v8 = vadd.f32 %v554_v5, %v381_v7 }
 0x131   : > { %v573_v9 = vpop.f32.mrf.mxu0 }
 0x132   : > { %v389_v10 = vadd.f32 %v388_v6, %v382_v8 }
 0x133   : > { %v384_v11 = vpop.f32.mrf.mxu0 }
 0x134   : > { %v390_v12 = vsel %vm343_vm1, %v389_v10, 0.0  ;;  %v395_v13 = vmul.f32 %v389_v10, %v389_v10 }
 0x135   : > { %391 = vadd.xlane.f32.xlu0 %v390_v12  ;;  %v574_v14 = vpop.f32.mrf.mxu0 }
 0x136   : > { %v396_v15 = vsel %vm343_vm1, %v395_v13, 0.0 }
 0x139   : > { %397 = vadd.xlane.f32.xlu0 %v396_v15 }
 0x1be   : > { %v392_v16 = vpop.xlane.xlu0 %391 }
 0x1bf   : > { %v394_v17 = vmul.f32 0.03125, %v392_v16 }
 0x1c1   : > { %v400_v19 = vmul.f32 %v394_v17, %v394_v17  ;;  %v412_v25 = vsub.f32 %v389_v10, %v394_v17 }
 0x1c2   : > { %v398_v18 = vpop.xlane.xlu0 %397 }
 0x1c3   : > { %v399_v20 = vmul.f32 0.03125, %v398_v18 }
 0x1c5   : > { %v401_v21 = vsub.f32 %v399_v20, %v400_v19 }
 0x1c7   : > { %v403_v22 = vadd.f32 1e-12, %v401_v21 }
 0x1c9   : > { %643 = vrsqrt.f32 %v403_v22 }
 0x1d6   : > { %v644_v24 = vpop.eup %643 }
 0x1d7   : > { %v411_v26 = vmul.f32 %v644_v24, %v558_v23 }
 0x1d9   : > { %v413_v28 = vmul.f32 %v412_v25, %v411_v26 }
 0x1db   : > { %v421_v29 = vadd.f32 %v559_v27, %v413_v28 }
 0x1dd   : > { %v422_v30 = vpack.c.bf16 %v421_v29, %v421_v29 }
 0x1df   : > { %424 = vst.msk [vmem:[%s317_s26] sm:$0xf] %vm423_vm2, %v422_v30 }
 0x1e0   : > { %740 = shalt.err (!%p737_p9)
}
 0x1e1   : > { %s741_s23 = scalar_lea.hbm %s437_s8, 64  ;;  %s745_s17 = scalar_lea.hbm %s1057_s6, 128 }
 0x1e2   : > { %p742_p1 = scmp.ne.s32.totalorder %s437_s8, %s741_s23  ;;  %p746_p7 = scmp.lt.s32.totalorder %s437_s8, %s1057_s6 }
 0x1e3   : > { %p747_p11 = scmp.lt.s32.totalorder %s745_s17, %s741_s23 }
 0x1e4   : > { %p743_p4 = pnand %p742_p1, %p1078_p12 }
 0x1e5   : > { %p748_p8 = por %p747_p11, %p746_p7 }
 0x1e6   : > { %p744_p6 = pneg %p743_p4 }
 0x1e8   : > { %p749_p3 = pnand %p748_p8, %p744_p6 }
 0x1ea   : > { %752 = shalt.err (!%p749_p3)
}
 0x1eb   : > { %583 = dma.vmem_to_hbm [thread:$0]  (%p1078_p12), %s440_s7, 64, %s437_s8, %s426_s10  }
 0x1ec PF: > { %s451_s20 = sand.u32 1, %s787_s21   ;;  %p1079_p10 = scmp.ne.s32.totalorder %s1066_s28, 0 }
 0x1ed   : > { %p1080_p2 = scmp.ge.s32.totalorder %s799_s24, 2  ;;  %s452_s13 = scalar_lea.sflag [#allocation4], %s451_s20 }
 0x1ef   : > { %p597_p13 = pnand %p1080_p2, %p1079_p10 }
 0x1f1   : > { %p598_p0 = pneg %p597_p13 }
 0x1f3   : > { %782 = dma.done.wait (%p598_p0), %s452_s13, 64  }
 0x1f4   : > { %784 = vsyncadd (%p598_p0), %s452_s13, 4294967232  ;;  %s1081_s14 = sld [smem:[#allocation13_spill]]  ;;  %p22_p5 = scmp.ge.s32.totalorder %s898_s9, 4  }
 0x1f5   : > { %s1082_s23 = sld [smem:[#allocation14_spill]]  ;;  %s1083_s21 = smov %s791_s22 }
 0x1f6   : > { %s1085_s24 = smov %s898_s9  ;;  %24 = sbr.rel (!%p22_p5) target bundleno = 9 (0x9), region = 106 }
 0x1fa   : > { %s1084_s22 = smov %s1081_s14 }
 0x1fb   :  { %457 = vsyncpa [#allocation3], 1 }
 0x1fc   :  { %459 = vsyncpa [#allocation3 + $0x1], 1 }
 0x1fd   :  { %460 = vsyncpa [#allocation6], 1 }
 0x1fe   :  { %462 = vsyncpa [#allocation6 + $0x1], 1 }
 0x1ff   :  { %463 = vsyncpa [#allocation4], 1 }
 0x200   :  { %465 = vsyncpa [#allocation4 + $0x1], 1 }

</bundles_post_ra>
